<compile_context>
chip_gen: v6e
topology: v6e:2x2x1
jax: 0.10.0
libtpu: 0.0.40
codegen_flags: <defaults>
</compile_context>

<pallas_src>
import functools

import jax
import jax.numpy as jnp
from jax.experimental import pallas as pl
from jax.experimental.pallas import tpu as pltpu

# ---------------- hyper-params (mirroring MeanFlow defaults) ----------------
EPS = 1e-3                    # self.eps
ADAPTIVE_P = 0.5              # adaptive_loss_weight_p
LOGIT_NORMAL_MEAN = -0.4
LOGIT_NORMAL_STD = 1.0
NOISE_STD_DEV = 1.0

# ---------------- model sizes ----------------
B, C, H, W = 2, 4, 16, 16
D = C * H * W                 # 1024
HID = 128                     # hidden width of the toy model


def meanflow_kernel(data_ref, noise_ref, tdt_ref,
                    w1_ref, bias1_ref, w2_ref, b2_ref,
                    out_ref, *, b_real):
    """MeanFlow training loss (scalar) for one (padded) batch.

    data_ref, noise_ref : (BP, D)   f32   (rows >= b_real are zero padding)
    tdt_ref             : (BP, 2)   f32   col 0 = times, col 1 = delta_times
    w1_ref              : (D, HID)  bf16
    bias1_ref           : (4, HID)  f32   rows = [b1, tw1, dw1, tw1 + dw1]
    w2_ref              : (HID, D)  bf16
    b2_ref              : (1, D)    f32
    out_ref             : (1, 1)    f32 in SMEM (scalar loss)
    """
    bp = data_ref.shape[0]

    data = data_ref[...]
    noise = noise_ref[...]
    t = tdt_ref[:, 0:1]                        # (BP, 1)
    dt = tdt_ref[:, 1:2]                       # (BP, 1)

    flow = noise - data                        # noise - data
    noised = data + t * flow                   # data.lerp(noise, t)

    # ---- fused primal + tangent first layer: [noised; flow] @ w1 ----
    lhs1 = jnp.concatenate([noised, flow], axis=0).astype(jnp.bfloat16)   # (2BP, D)
    z = jnp.dot(lhs1, w1_ref[...], preferred_element_type=jnp.float32)    # (2BP, HID)

    b1 = bias1_ref[0:1, :]
    tw1 = bias1_ref[1:2, :]
    dw1 = bias1_ref[2:3, :]
    tw1_plus_dw1 = bias1_ref[3:4, :]

    h = z[:bp] + t * tw1 + dt * dw1 + b1       # primal hidden pre-activation
    dh = z[bp:] + tw1_plus_dw1                 # tangent (t,dt tangents are 1)
    a = jnp.tanh(h)
    da = (1.0 - a * a) * dh                    # tanh'(h) * dh

    # ---- fused primal + tangent second layer: [a; da] @ w2 ----
    lhs2 = jnp.concatenate([a, da], axis=0).astype(jnp.bfloat16)          # (2BP, HID)
    z2 = jnp.dot(lhs2, w2_ref[...], preferred_element_type=jnp.float32)   # (2BP, D)
    pred = z2[:bp] + b2_ref[...]               # model(noised, t, dt)
    rate_avg_vel_change = z2[bp:]              # jvp tangent output

    # ---- mean-flow target & loss ----
    integral = dt * rate_avg_vel_change        # padded_delta_times * jvp
    target = flow - integral
    sq = (pred - target) ** 2                  # mse, reduction='none'

    per_b = jnp.mean(sq, axis=-1, keepdims=True)           # 'b ... -> b', (BP, 1)
    weight = jax.lax.rsqrt(per_b + EPS)                     # 1/(loss+eps)^0.5
    weighted = per_b * weight

    # mask out padded rows, mean over the real batch
    rows = jax.lax.broadcasted_iota(jnp.int32, (bp, 1), 0)
    valid = (rows < b_real).astype(jnp.float32)
    out_ref[0, 0] = jnp.sum(weighted * valid) * (1.0 / b_real)


def meanflow_loss(data_nchw, noise_nchw, times, delta_times, params):
    """Wrapper: flatten NCHW, pad batch to 8 sublanes, invoke the kernel."""
    w1, b1, tw1, dw1, w2, b2 = params
    batch = data_nchw.shape[0]
    data_flat = data_nchw.reshape(batch, -1).astype(jnp.float32)
    noise_flat = noise_nchw.reshape(batch, -1).astype(jnp.float32)
    d = data_flat.shape[1]
    hid = w1.shape[1]

    bp = max(8, ((batch + 7) // 8) * 8)        # sublane-aligned batch
    pad = bp - batch
    data_p = jnp.pad(data_flat, ((0, pad), (0, 0)))
    noise_p = jnp.pad(noise_flat, ((0, pad), (0, 0)))
    tdt = jnp.stack([times.astype(jnp.float32),
                     delta_times.astype(jnp.float32)], axis=-1)          # (batch, 2)
    tdt_p = jnp.pad(tdt, ((0, pad), (0, 0)))

    # consolidated bias rows + precomputed (tw1 + dw1); bf16 weights
    bias1 = jnp.concatenate([b1, tw1, dw1, tw1 + dw1], axis=0).astype(jnp.float32)
    w1_bf = w1.astype(jnp.bfloat16)
    w2_bf = w2.astype(jnp.bfloat16)
    b2_f = b2.astype(jnp.float32)

    inputs = (data_p, noise_p, tdt_p, w1_bf, bias1, w2_bf, b2_f)

    cost = pl.CostEstimate(
        flops=2 * (2 * bp) * d * hid + 2 * (2 * bp) * hid * d,
        transcendentals=bp * hid + bp,
        bytes_accessed=(2 * bp * d * 4 + bp * 2 * 4 + d * hid * 2
                        + 4 * hid * 4 + hid * d * 2 + d * 4 + 4),
    )

    vmem = pltpu.MemorySpace.VMEM
    smem = pltpu.MemorySpace.SMEM
    out = pl.pallas_call(
        functools.partial(meanflow_kernel, b_real=batch),
        out_shape=jax.ShapeDtypeStruct((1, 1), jnp.float32),
        in_specs=[pl.BlockSpec(memory_space=vmem) for _ in inputs],
        out_specs=pl.BlockSpec(memory_space=smem),
        cost_estimate=cost,
    )(*inputs)
    return out[0, 0]


def meanflow_loss_ref(data_nchw, noise_nchw, times, delta_times, params,
                      matmul_dtype=jnp.float32):
    """Pure-JAX reference (jax.jvp).  matmul_dtype=bfloat16 mirrors the kernel's
    MXU numerics; float32 is the module-faithful reference."""
    w1, b1, tw1, dw1, w2, b2 = params
    w1m = w1.astype(matmul_dtype)
    w2m = w2.astype(matmul_dtype)
    data = data_nchw.reshape(data_nchw.shape[0], -1).astype(jnp.float32)
    noise = noise_nchw.reshape(noise_nchw.shape[0], -1).astype(jnp.float32)
    t = times.reshape(-1, 1).astype(jnp.float32)
    dt = delta_times.reshape(-1, 1).astype(jnp.float32)
    flow = noise - data
    noised = data + t * flow

    def model(x, tt, dtt):
        hh = jnp.dot(x.astype(matmul_dtype), w1m,
                     preferred_element_type=jnp.float32)
        hh = hh + tt * tw1 + dtt * dw1 + b1
        aa = jnp.tanh(hh)
        return jnp.dot(aa.astype(matmul_dtype), w2m,
                       preferred_element_type=jnp.float32) + b2

    pred, rate = jax.jvp(model, (noised, t, dt),
                         (flow, jnp.ones_like(t), jnp.ones_like(dt)))
    integral = dt * rate
    target = flow - integral
    per_b = jnp.mean((pred - target) ** 2, axis=-1)
    weight = 1.0 / jnp.power(per_b + EPS, ADAPTIVE_P)
    return jnp.mean(per_b * weight)


def sample_times(key, batch):
    """logit-normal sampler: sigmoid(normal(mean=-0.4, std=1.0))."""
    z = LOGIT_NORMAL_MEAN + LOGIT_NORMAL_STD * jax.random.normal(key, (batch,))
    return jax.nn.sigmoid(z)


if __name__ == "__main__":
    key = jax.random.PRNGKey(0)
    (k_data, k_noise, k_t, k_t2,
     k_w1, k_tw1, k_dw1, k_w2) = jax.random.split(key, 8)

    # deterministic toy-model parameters
    w1 = jax.random.normal(k_w1, (D, HID), jnp.float32) / jnp.sqrt(D)
    b1 = jnp.zeros((1, HID), jnp.float32)
    tw1 = jax.random.normal(k_tw1, (1, HID), jnp.float32) * 0.1
    dw1 = jax.random.normal(k_dw1, (1, HID), jnp.float32) * 0.1
    w2 = jax.random.normal(k_w2, (HID, D), jnp.float32) / jnp.sqrt(HID)
    b2 = jnp.zeros((1, D), jnp.float32)
    params = (w1, b1, tw1, dw1, w2, b2)

    # data (NCHW) + noise + times (glue, plain JAX)
    data = jax.random.normal(k_data, (B, C, H, W), jnp.float32)
    noise = jax.random.normal(k_noise, (B, C, H, W), jnp.float32) * NOISE_STD_DEV

    times = sample_times(k_t, B)
    integral_start_times = sample_times(k_t2, B) * times     # JVP (mean-flow) branch
    delta_times = times - integral_start_times

    loss_fn = jax.jit(meanflow_loss)
    loss = jax.block_until_ready(loss_fn(data, noise, times, delta_times, params))

    # kernel-numerics reference (bf16 matmuls, f32 accumulation) — tight check
    loss_ref_bf16 = jax.block_until_ready(
        meanflow_loss_ref(data, noise, times, delta_times, params,
                          matmul_dtype=jnp.bfloat16))
    # module-faithful f32 reference — loose check (bf16 operand rounding)
    loss_ref_f32 = jax.block_until_ready(
        meanflow_loss_ref(data, noise, times, delta_times, params,
                          matmul_dtype=jnp.float32))

    assert jnp.allclose(loss, loss_ref_bf16, rtol=2e-3, atol=1e-5), (loss, loss_ref_bf16)
    assert jnp.allclose(loss, loss_ref_f32, rtol=3e-2, atol=1e-3), (loss, loss_ref_f32)

    print("KERNEL_OK")
</pallas_src>

<mosaic_0001>
module attributes {stable_mosaic.version = 11 : i64} {
  func.func @meanflow_kernel(%arg0: memref<8x1024xf32, #tpu.memory_space<vmem>>, %arg1: memref<8x1024xf32, #tpu.memory_space<vmem>>, %arg2: memref<8x2xf32, #tpu.memory_space<vmem>>, %arg3: memref<1024x128xbf16, #tpu.memory_space<vmem>>, %arg4: memref<4x128xf32, #tpu.memory_space<vmem>>, %arg5: memref<128x1024xbf16, #tpu.memory_space<vmem>>, %arg6: memref<1x1024xf32, #tpu.memory_space<vmem>>, %arg7: memref<1x1xf32, #tpu.memory_space<smem>>) attributes {dimension_semantics = [], scalar_prefetch = 0 : i64, scratch_operands = 0 : i64, tpu.core_type = #tpu.core_type<tc>} {
    %c0 = arith.constant 0 : index
    %c0_0 = arith.constant 0 : index
    %0 = vector.load %arg0[%c0, %c0_0] : memref<8x1024xf32, #tpu.memory_space<vmem>>, vector<8x1024xf32>
    %c0_1 = arith.constant 0 : index
    %c0_2 = arith.constant 0 : index
    %1 = vector.load %arg1[%c0_1, %c0_2] : memref<8x1024xf32, #tpu.memory_space<vmem>>, vector<8x1024xf32>
    %c0_3 = arith.constant 0 : index
    %c0_4 = arith.constant 0 : index
    %2 = vector.load %arg2[%c0_3, %c0_4] : memref<8x2xf32, #tpu.memory_space<vmem>>, vector<8x1xf32>
    %c0_5 = arith.constant 0 : index
    %c1 = arith.constant 1 : index
    %3 = vector.load %arg2[%c0_5, %c1] : memref<8x2xf32, #tpu.memory_space<vmem>>, vector<8x1xf32>
    %4 = arith.subf %1, %0 : vector<8x1024xf32>
    %5 = vector.broadcast %2 : vector<8x1xf32> to vector<8x1024xf32>
    %6 = arith.mulf %5, %4 : vector<8x1024xf32>
    %7 = arith.addf %0, %6 : vector<8x1024xf32>
    %8 = tpu.concatenate %7, %4 in 0 : vector<8x1024xf32>, vector<8x1024xf32> -> vector<16x1024xf32>
    %9 = arith.truncf %8 : vector<16x1024xf32> to vector<16x1024xbf16>
    %c0_6 = arith.constant 0 : index
    %c0_7 = arith.constant 0 : index
    %10 = vector.load %arg3[%c0_6, %c0_7] : memref<1024x128xbf16, #tpu.memory_space<vmem>>, vector<1024x128xbf16>
    %cst = arith.constant dense<0.000000e+00> : vector<16x128xf32>
    %11 = tpu.matmul %9, %10, %cst {dimension_numbers = #tpu.dot_dimension_numbers<[1], [0], [0], [1], [0, 0, 1, 1], [], []>} : vector<16x1024xbf16>, vector<1024x128xbf16>, vector<16x128xf32> -> vector<16x128xf32>
    %c0_8 = arith.constant 0 : index
    %c0_9 = arith.constant 0 : index
    %12 = vector.load %arg4[%c0_8, %c0_9] : memref<4x128xf32, #tpu.memory_space<vmem>>, vector<1x128xf32>
    %c1_10 = arith.constant 1 : index
    %c0_11 = arith.constant 0 : index
    %13 = vector.load %arg4[%c1_10, %c0_11] : memref<4x128xf32, #tpu.memory_space<vmem>>, vector<1x128xf32>
    %c2 = arith.constant 2 : index
    %c0_12 = arith.constant 0 : index
    %14 = vector.load %arg4[%c2, %c0_12] : memref<4x128xf32, #tpu.memory_space<vmem>>, vector<1x128xf32>
    %c3 = arith.constant 3 : index
    %c0_13 = arith.constant 0 : index
    %15 = vector.load %arg4[%c3, %c0_13] : memref<4x128xf32, #tpu.memory_space<vmem>>, vector<1x128xf32>
    %16 = vector.extract_strided_slice %11 {offsets = [0, 0], sizes = [8, 128], strides = [1, 1]} : vector<16x128xf32> to vector<8x128xf32>
    %17 = vector.broadcast %2 : vector<8x1xf32> to vector<8x128xf32>
    %18 = vector.broadcast %13 : vector<1x128xf32> to vector<8x128xf32>
    %19 = arith.mulf %17, %18 : vector<8x128xf32>
    %20 = arith.addf %16, %19 : vector<8x128xf32>
    %21 = vector.broadcast %3 : vector<8x1xf32> to vector<8x128xf32>
    %22 = vector.broadcast %14 : vector<1x128xf32> to vector<8x128xf32>
    %23 = arith.mulf %21, %22 : vector<8x128xf32>
    %24 = arith.addf %20, %23 : vector<8x128xf32>
    %25 = vector.broadcast %12 : vector<1x128xf32> to vector<8x128xf32>
    %26 = arith.addf %24, %25 : vector<8x128xf32>
    %27 = vector.extract_strided_slice %11 {offsets = [8, 0], sizes = [8, 128], strides = [1, 1]} : vector<16x128xf32> to vector<8x128xf32>
    %28 = vector.broadcast %15 : vector<1x128xf32> to vector<8x128xf32>
    %29 = arith.addf %27, %28 : vector<8x128xf32>
    %30 = math.tanh %26 : vector<8x128xf32>
    %31 = arith.mulf %30, %30 : vector<8x128xf32>
    %cst_14 = arith.constant 1.000000e+00 : f32
    %32 = vector.broadcast %cst_14 : f32 to vector<8x128xf32>
    %33 = arith.subf %32, %31 : vector<8x128xf32>
    %34 = arith.mulf %33, %29 : vector<8x128xf32>
    %35 = tpu.concatenate %30, %34 in 0 : vector<8x128xf32>, vector<8x128xf32> -> vector<16x128xf32>
    %36 = arith.truncf %35 : vector<16x128xf32> to vector<16x128xbf16>
    %c0_15 = arith.constant 0 : index
    %c0_16 = arith.constant 0 : index
    %37 = vector.load %arg5[%c0_15, %c0_16] : memref<128x1024xbf16, #tpu.memory_space<vmem>>, vector<128x1024xbf16>
    %cst_17 = arith.constant dense<0.000000e+00> : vector<16x1024xf32>
    %38 = tpu.matmul %36, %37, %cst_17 {dimension_numbers = #tpu.dot_dimension_numbers<[1], [0], [0], [1], [0, 0, 1, 1], [], []>} : vector<16x128xbf16>, vector<128x1024xbf16>, vector<16x1024xf32> -> vector<16x1024xf32>
    %39 = vector.extract_strided_slice %38 {offsets = [0, 0], sizes = [8, 1024], strides = [1, 1]} : vector<16x1024xf32> to vector<8x1024xf32>
    %c0_18 = arith.constant 0 : index
    %c0_19 = arith.constant 0 : index
    %40 = vector.load %arg6[%c0_18, %c0_19] : memref<1x1024xf32, #tpu.memory_space<vmem>>, vector<1x1024xf32>
    %41 = vector.broadcast %40 : vector<1x1024xf32> to vector<8x1024xf32>
    %42 = arith.addf %39, %41 : vector<8x1024xf32>
    %43 = vector.extract_strided_slice %38 {offsets = [8, 0], sizes = [8, 1024], strides = [1, 1]} : vector<16x1024xf32> to vector<8x1024xf32>
    %44 = vector.broadcast %3 : vector<8x1xf32> to vector<8x1024xf32>
    %45 = arith.mulf %44, %43 : vector<8x1024xf32>
    %46 = arith.subf %4, %45 : vector<8x1024xf32>
    %47 = arith.subf %42, %46 : vector<8x1024xf32>
    %48 = arith.mulf %47, %47 : vector<8x1024xf32>
    %cst_20 = arith.constant dense<0.000000e+00> : vector<8xf32>
    %49 = vector.multi_reduction <add>, %48, %cst_20 [1] : vector<8x1024xf32> to vector<8xf32>
    %50 = vector.shape_cast %49 : vector<8xf32> to vector<8x1xf32>
    %cst_21 = arith.constant 1.024000e+03 : f32
    %51 = vector.broadcast %cst_21 : f32 to vector<8x1xf32>
    %52 = arith.divf %50, %51 : vector<8x1xf32>
    %cst_22 = arith.constant 1.000000e-03 : f32
    %53 = vector.broadcast %cst_22 : f32 to vector<8x1xf32>
    %54 = arith.addf %52, %53 : vector<8x1xf32>
    %55 = math.rsqrt %54 : vector<8x1xf32>
    %56 = arith.mulf %52, %55 : vector<8x1xf32>
    %57 = tpu.iota {dimensions = array<i32: 0>} : vector<8x1xi32>
    %c2_i32 = arith.constant 2 : i32
    %58 = vector.broadcast %c2_i32 : i32 to vector<8x1xi32>
    %59 = arith.cmpi slt, %57, %58 : vector<8x1xi32>
    %60 = arith.extui %59 : vector<8x1xi1> to vector<8x1xi32>
    %61 = arith.sitofp %60 : vector<8x1xi32> to vector<8x1xf32>
    %62 = arith.mulf %56, %61 : vector<8x1xf32>
    %63 = vector.shape_cast %62 : vector<8x1xf32> to vector<1x8x1xf32>
    %cst_23 = arith.constant dense<0.000000e+00> : vector<1xf32>
    %64 = vector.multi_reduction <add>, %63, %cst_23 [1, 2] : vector<1x8x1xf32> to vector<1xf32>
    %65 = vector.shape_cast %64 : vector<1xf32> to vector<1x1x1xf32>
    %66 = vector.extract %65[0, 0, 0] : f32 from vector<1x1x1xf32>
    %cst_24 = arith.constant 5.000000e-01 : f32
    %67 = arith.mulf %66, %cst_24 : f32
    %c0_25 = arith.constant 0 : index
    %c0_26 = arith.constant 0 : index
    %68 = memref.load %arg7[%c0_25, %c0_26] : memref<1x1xf32, #tpu.memory_space<smem>>
    memref.store %67, %arg7[%c0_25, %c0_26] : memref<1x1xf32, #tpu.memory_space<smem>>
    return
  }
}

</mosaic_0001>

<bundles_post_ra>
// kernel: meanflow_loss.1
= control target key start
LH: loop header
LB: loop body
LE: loop exit
PB: predicated region body
PF: predicated region fallthrough
CT: control target
= control target key end

     0   :  { %v1785_v1 = vmov 0   ;;  %v1786_v36 = vmov 1   ;;  %s2392_s0 = inlined_call_operand.vmem [shape: f32[8,1024], index: 0, kind: input, shape index: {}]   ;;  %s2393_s1 = inlined_call_operand.vmem [shape: f32[8,1024], index: 1, kind: input, shape index: {}]   ;;  %s2394_s2 = inlined_call_operand.vmem [shape: f32[8,2], index: 2, kind: input, shape index: {}]   ;;  %s2395_s3 = inlined_call_operand.vmem [shape: bf16[1024,128], index: 3, kind: input, shape index: {}]   ;;  %s2396_s4 = inlined_call_operand.vmem [shape: f32[4,128], index: 4, kind: input, shape index: {}]   ;;  %s2397_s5 = inlined_call_operand.vmem [shape: bf16[128,1024], index: 5, kind: input, shape index: {}]   ;;  %s2398_s6 = inlined_call_operand.vmem [shape: f32[1,1024], index: 6, kind: input, shape index: {}]   ;;  %s2399_s7 = inlined_call_operand.hbm [shape: f32[1,1], index: 7, kind: output, shape index: {}]  }
   0x1   :  { %v1832_v0 = vld [vmem:[%s2394_s2] sm:$0xff]  ;;  %1705 = vset.pattern.permute.xlu0 %v1785_v1  ;;  %v1707_v2 = vld [vmem:[%s2395_s3 + $0x78] sm:$0xff]   ;;  %v1711_v6 = vld [vmem:[%s2395_s3 + $0x70] sm:$0xff]  }
   0x2   :  { %55 = vperm.xlu0 %1705, %v1832_v0   ;;  %v1708_v3 = vld [vmem:[%s2395_s3 + $0xf8] sm:$0xff]   ;;  %1611 = vmatprep.subr.bf16.mxu0 %v1707_v2  ;;  %v1712_v7 = vld [vmem:[%s2395_s3 + $0xf0] sm:$0xff]   ;;  %v1715_v10 = vld [vmem:[%s2395_s3 + $0x68] sm:$0xff]  }
   0x3   :  { %v1709_v4 = vld [vmem:[%s2395_s3 + $0x38] sm:$0xff]   ;;  %1633 = vmatprep.subr.bf16.mxu1 %v1708_v3  ;;  %v1713_v8 = vld [vmem:[%s2395_s3 + $0x30] sm:$0xff]   ;;  %v1716_v11 = vld [vmem:[%s2395_s3 + $0xe8] sm:$0xff]  }
   0x4   :  { %v1710_v5 = vld [vmem:[%s2395_s3 + $0xb8] sm:$0xff]   ;;  %1612 = vmatpush3.bf16.msra.mxu0 %v1709_v4  ;;  %v1714_v9 = vld [vmem:[%s2395_s3 + $0xb0] sm:$0xff]   ;;  %v1717_v12 = vld [vmem:[%s2395_s3 + $0x28] sm:$0xff]  }
   0x5   :  { %1634 = vmatpush3.bf16.msra.mxu1 %v1710_v5  ;;  %1613 = vmatprep.subr.bf16.mxu0 %v1711_v6  ;;  %v1718_v13 = vld [vmem:[%s2395_s3 + $0xa8] sm:$0xff]   ;;  %v1719_v14 = vld [vmem:[%s2395_s3 + $0x60] sm:$0xff]   ;;  %v1723_v18 = vld [vmem:[%s2395_s3 + $0x58] sm:$0xff]  }
   0x6   :  { %1635 = vmatprep.subr.bf16.mxu1 %v1712_v7  ;;  %v1720_v15 = vld [vmem:[%s2395_s3 + $0xe0] sm:$0xff]   ;;  %v1724_v19 = vld [vmem:[%s2395_s3 + $0xd8] sm:$0xff]   ;;  %v1727_v22 = vld [vmem:[%s2395_s3 + $0x50] sm:$0xff]   ;;  %1706 = vset.pattern.permute.xlu0 %v1786_v36 }
   0x7   :  { %v1721_v16 = vld [vmem:[%s2395_s3 + $0x20] sm:$0xff]   ;;  %v1725_v20 = vld [vmem:[%s2395_s3 + $0x18] sm:$0xff]   ;;  %v1728_v23 = vld [vmem:[%s2395_s3 + $0xd0] sm:$0xff]   ;;  %769 = vperm.xlu0 %1706, %v1832_v0  }
   0x8   :  { %1614 = vmatpush3.bf16.msra.mxu0 %v1713_v8  ;;  %v1722_v17 = vld [vmem:[%s2395_s3 + $0xa0] sm:$0xff]   ;;  %v1726_v21 = vld [vmem:[%s2395_s3 + $0x98] sm:$0xff]   ;;  %v1729_v24 = vld [vmem:[%s2395_s3 + $0x10] sm:$0xff]  }
   0x9   :  { %1636 = vmatpush3.bf16.msra.mxu1 %v1714_v9  ;;  %1615 = vmatprep.subr.bf16.mxu0 %v1715_v10  ;;  %v1730_v25 = vld [vmem:[%s2395_s3 + $0x90] sm:$0xff]   ;;  %v1731_v26 = vld [vmem:[%s2395_s3 + $0x48] sm:$0xff]   ;;  %v1735_v30 = vld [vmem:[%s2395_s3 + $0x40] sm:$0xff]  }
   0xa   :  { %1637 = vmatprep.subr.bf16.mxu1 %v1716_v11  ;;  %v1732_v27 = vld [vmem:[%s2395_s3 + $0xc8] sm:$0xff]   ;;  %v1736_v31 = vld [vmem:[%s2395_s3 + $0xc0] sm:$0xff]   ;;  %v1739_v34 = vld [vmem:[%s2395_s3 + $0x178] sm:$0xff]  }
   0xb   :  { %v1733_v28 = vld [vmem:[%s2395_s3 + $0x8] sm:$0xff]   ;;  %v1737_v32 = vld [vmem:[%s2395_s3] sm:$0xff]   ;;  %v1740_v35 = vld [vmem:[%s2395_s3 + $0x1f8] sm:$0xff]  }
   0xc   :  { %1616 = vmatpush3.bf16.msra.mxu0 %v1717_v12  ;;  %v1734_v29 = vld [vmem:[%s2395_s3 + $0x88] sm:$0xff]   ;;  %v1738_v33 = vld [vmem:[%s2395_s3 + $0x80] sm:$0xff]  }
   0xd   :  { %1638 = vmatpush3.bf16.msra.mxu1 %v1718_v13  ;;  %1617 = vmatprep.subr.bf16.mxu0 %v1719_v14 }
   0xe   :  { %1639 = vmatprep.subr.bf16.mxu1 %v1720_v15 }
  0x10   :  { %1618 = vmatpush3.bf16.msra.mxu0 %v1721_v16 }
  0x11   :  { %1640 = vmatpush3.bf16.msra.mxu1 %v1722_v17  ;;  %1619 = vmatprep.subr.bf16.mxu0 %v1723_v18 }
  0x12   :  { %1641 = vmatprep.subr.bf16.mxu1 %v1724_v19 }
  0x14   :  { %1620 = vmatpush3.bf16.msra.mxu0 %v1725_v20 }
  0x15   :  { %1642 = vmatpush3.bf16.msra.mxu1 %v1726_v21  ;;  %1621 = vmatprep.subr.bf16.mxu0 %v1727_v22 }
  0x16   :  { %1643 = vmatprep.subr.bf16.mxu1 %v1728_v23 }
  0x18   :  { %1622 = vmatpush3.bf16.msra.mxu0 %v1729_v24 }
  0x19   :  { %1644 = vmatpush3.bf16.msra.mxu1 %v1730_v25  ;;  %1623 = vmatprep.subr.bf16.mxu0 %v1731_v26 }
  0x1a   :  { %1645 = vmatprep.subr.bf16.mxu1 %v1732_v27 }
  0x1c   :  { %1624 = vmatpush3.bf16.msra.mxu0 %v1733_v28 }
  0x1d   :  { %1646 = vmatpush3.bf16.msra.mxu1 %v1734_v29  ;;  %1625 = vmatprep.subr.bf16.mxu0 %v1735_v30 }
  0x1e   :  { %1647 = vmatprep.subr.bf16.mxu1 %v1736_v31 }
  0x20   :  { %1626 = vmatpush3.bf16.msra.mxu0 %v1737_v32 }
  0x21   :  { %1648 = vmatpush3.bf16.msra.mxu1 %v1738_v33  ;;  %1655 = vmatprep.subr.bf16.mxu0 %v1739_v34 }
  0x22   :  { %1677 = vmatprep.subr.bf16.mxu1 %v1740_v35 }
  0x23   :  { %12 = vsyncpa [#allocation3], 0  ;;  %v29_v37 = vld [vmem:[%s2392_s0 + $0x8] sm:$0xff]  ;;  %v31_v39 = vld [vmem:[%s2392_s0 + $0x18] sm:$0xff]  ;;  %vm1451_vm1 = vcmask 7168   ;;  %s1788_s17 = smov [#allocation2]  }
  0x24   :  { %v37_v38 = vld [vmem:[%s2393_s1 + $0x8] sm:$0xff]  ;;  %v39_v40 = vld [vmem:[%s2393_s1 + $0x18] sm:$0xff]  ;;  %v28_v41 = vld [vmem:[%s2392_s0] sm:$0xff] }
  0x25   :  { %v36_v42 = vld [vmem:[%s2393_s1] sm:$0xff]  ;;  %v30_v43 = vld [vmem:[%s2392_s0 + $0x10] sm:$0xff]  ;;  %v33_v45 = vld [vmem:[%s2392_s0 + $0x28] sm:$0xff]  ;;  %v1975_v49 = vsub.f32 %v37_v38, %v29_v37  ;;  %v1977_v50 = vsub.f32 %v39_v40, %v31_v39 }
  0x26   :  { %v38_v44 = vld [vmem:[%s2393_s1 + $0x10] sm:$0xff]  ;;  %v41_v46 = vld [vmem:[%s2393_s1 + $0x28] sm:$0xff]  ;;  %v35_v47 = vld [vmem:[%s2392_s0 + $0x38] sm:$0xff]  ;;  %v1979_v51 = vsub.f32 %v36_v42, %v28_v41 }
  0x27   :  { %v43_v48 = vld [vmem:[%s2393_s1 + $0x38] sm:$0xff]  ;;  %v1981_v52 = vsub.f32 %v38_v44, %v30_v43  ;;  %v1983_v53 = vsub.f32 %v41_v46, %v33_v45  ;;  %v1743_v11 = vld [vmem:[%s2395_s3 + $0x170] sm:$0xff]   ;;  %v1747_v17 = vld [vmem:[%s2395_s3 + $0x168] sm:$0xff]  }
  0x28   :  { %v1985_v54 = vsub.f32 %v43_v48, %v35_v47  ;;  %v1741_v9 = vld [vmem:[%s2395_s3 + $0x138] sm:$0xff]   ;;  %v1744_v12 = vld [vmem:[%s2395_s3 + $0x1f0] sm:$0xff]   ;;  %v1748_v18 = vld [vmem:[%s2395_s3 + $0x1e8] sm:$0xff]  }
  0x29   :  { %v1742_v10 = vld [vmem:[%s2395_s3 + $0x1b8] sm:$0xff]   ;;  %v1745_v15 = vld [vmem:[%s2395_s3 + $0x130] sm:$0xff]   ;;  %v1749_v19 = vld [vmem:[%s2395_s3 + $0x128] sm:$0xff]  }
  0x2a   :  { %v1746_v16 = vld [vmem:[%s2395_s3 + $0x1b0] sm:$0xff]   ;;  %v1750_v20 = vld [vmem:[%s2395_s3 + $0x1a8] sm:$0xff]   ;;  %v1751_v21 = vld [vmem:[%s2395_s3 + $0x160] sm:$0xff]  }
  0x2b   :  { %v1752_v22 = vld [vmem:[%s2395_s3 + $0x1e0] sm:$0xff]   ;;  %v1755_v25 = vld [vmem:[%s2395_s3 + $0x158] sm:$0xff]   ;;  %v1759_v29 = vld [vmem:[%s2395_s3 + $0x150] sm:$0xff]  }
  0x2c   :  { %v1753_v23 = vld [vmem:[%s2395_s3 + $0x120] sm:$0xff]   ;;  %v1756_v26 = vld [vmem:[%s2395_s3 + $0x1d8] sm:$0xff]   ;;  %v1760_v30 = vld [vmem:[%s2395_s3 + $0x1d0] sm:$0xff]  }
  0x2d   :  { %v1754_v24 = vld [vmem:[%s2395_s3 + $0x1a0] sm:$0xff]   ;;  %v1757_v27 = vld [vmem:[%s2395_s3 + $0x118] sm:$0xff]   ;;  %v34_v33 = vld [vmem:[%s2392_s0 + $0x30] sm:$0xff] }
  0x2e   :  { %v1758_v28 = vld [vmem:[%s2395_s3 + $0x198] sm:$0xff]   ;;  %v32_v31 = vld [vmem:[%s2392_s0 + $0x20] sm:$0xff]  ;;  %v42_v34 = vld [vmem:[%s2393_s1 + $0x30] sm:$0xff] }
  0x2f   :  { %v40_v32 = vld [vmem:[%s2393_s1 + $0x20] sm:$0xff]  ;;  %v1761_v35 = vld [vmem:[%s2395_s3 + $0x110] sm:$0xff]   ;;  %v1764_v38 = vld [vmem:[%s2395_s3 + $0x1c8] sm:$0xff]   ;;  %v2093_v40 = vsub.f32 %v42_v34, %v34_v33 }
  0x30   :  { %v1762_v36 = vld [vmem:[%s2395_s3 + $0x190] sm:$0xff]   ;;  %v1766_v42 = vld [vmem:[%s2395_s3 + $0x188] sm:$0xff]   ;;  %v1768_v44 = vld [vmem:[%s2395_s3 + $0x1c0] sm:$0xff]  }
  0x31   :  { %v1770_v48 = vld [vmem:[%s2395_s3 + $0x180] sm:$0xff]  }
  0x7d   :  { %v1987_v55 = vpop.permute.xlu0 %55 }
  0x7e   :  { %v59_v56 = vmul.f32 %v1987_v55, %v1975_v49  ;;  %v61_v57 = vmul.f32 %v1987_v55, %v1977_v50  ;;  %v58_v58 = vmul.f32 %v1987_v55, %v1979_v51  ;;  %v60_v59 = vmul.f32 %v1987_v55, %v1981_v52 }
  0x7f   :  { %v63_v60 = vmul.f32 %v1987_v55, %v1983_v53  ;;  %v65_v61 = vmul.f32 %v1987_v55, %v1985_v54  ;;  %v64_v46 = vmul.f32 %v1987_v55, %v2093_v40 }
  0x80   :  { %v67_v62 = vadd.f32 %v59_v56, %v29_v37  ;;  %v69_v63 = vadd.f32 %v61_v57, %v31_v39  ;;  %v66_v0 = vadd.f32 %v58_v58, %v28_v41  ;;  %v68_v2 = vadd.f32 %v60_v59, %v30_v43  ;;  %v1763_v37 = vld [vmem:[%s2395_s3 + $0x148] sm:$0xff]   ;;  %v1767_v43 = vld [vmem:[%s2395_s3 + $0x140] sm:$0xff]  }
  0x81   :  { %v71_v3 = vadd.f32 %v63_v60, %v33_v45  ;;  %v73_v4 = vadd.f32 %v65_v61, %v35_v47  ;;  %v2091_v39 = vsub.f32 %v40_v32, %v32_v31  ;;  %v1765_v41 = vld [vmem:[%s2395_s3 + $0x108] sm:$0xff]   ;;  %v1769_v47 = vld [vmem:[%s2395_s3 + $0x100] sm:$0xff]   ;;  %v72_v57 = vadd.f32 %v64_v46, %v34_v33  ;;  %v2213_v46 = vld [vmem:[%s2397_s5 + $0x1f8] sm:$0xff] }
  0x82   :  { %v75_v5 = vpack.c.bf16 %v1975_v49, %v67_v62  ;;  %v77_v6 = vpack.c.bf16 %v1977_v50, %v69_v63  ;;  %v74_v7 = vpack.c.bf16 %v1979_v51, %v66_v0  ;;  %v76_v8 = vpack.c.bf16 %v1981_v52, %v68_v2  ;;  %v849_v60 = vld [vmem:[%s2397_s5 + $0x1c0] sm:$0xff]  ;;  %v850_v62 = vld [vmem:[%s2397_s5 + $0x1c8] sm:$0xff] }
  0x83   :  { %v79_v13 = vpack.c.bf16 %v1983_v53, %v71_v3  ;;  %v81_v14 = vpack.c.bf16 %v1985_v54, %v73_v4  ;;  %v62_v45 = vmul.f32 %v1987_v55, %v2091_v39  ;;  %v80_v59 = vpack.c.bf16 %v2093_v40, %v72_v57  ;;  %v853_v61 = vld [vmem:[%s2397_s5 + $0x1e0] sm:$0xff]  ;;  %v854_v0 = vld [vmem:[%s2397_s5 + $0x1e8] sm:$0xff] }
  0x84   :  { %626 = vmatprep.mubr.bf16.mxu0 %v75_v5  ;;  %667 = vmatprep.mubr.bf16.mxu1 %v77_v6  ;;  %v1603_v63 = vcombine.high %v849_v60, %v853_v61  ;;  %v1602_v2 = vcombine.low %v849_v60, %v853_v61  ;;  %v1604_v3 = vcombine.low %v850_v62, %v854_v0  ;;  %v841_v5 = vld [vmem:[%s2397_s5 + $0x180] sm:$0xff]  ;;  %v802_v60 = vld [vmem:[%s2397_s5 + $0x48] sm:$0xff] }
  0x85   :  { %627 = vmatmul.mubr.bf16.vlgmr.msra.gmra.mxu0 %v74_v7  ;;  %668 = vmatmul.mubr.bf16.vlgmr.msra.gmra.mxu1 %v76_v8  ;;  %v70_v56 = vadd.f32 %v62_v45, %v32_v31  ;;  %v1605_v4 = vcombine.high %v850_v62, %v854_v0  ;;  %v845_v6 = vld [vmem:[%s2397_s5 + $0x1a0] sm:$0xff]  ;;  %v842_v7 = vld [vmem:[%s2397_s5 + $0x188] sm:$0xff]  ;;  %v2208_v45 = vld [vmem:[%s2397_s5 + $0x1d8] sm:$0xff] }
  0x86   :  { %1656 = vmatpush3.bf16.msra.mxu0 %v1741_v9  ;;  %1678 = vmatpush3.bf16.msra.mxu1 %v1742_v10  ;;  %v1595_v8 = vcombine.high %v841_v5, %v845_v6  ;;  %v846_v9 = vld [vmem:[%s2397_s5 + $0x1a8] sm:$0xff]  ;;  %v1594_v10 = vcombine.low %v841_v5, %v845_v6 }
  0x87   :  { %708 = vmatprep.mubr.bf16.mxu0 %v79_v13  ;;  %749 = vmatprep.mubr.bf16.mxu1 %v81_v14  ;;  %v78_v58 = vpack.c.bf16 %v2091_v39, %v70_v56  ;;  %v833_v13 = vld [vmem:[%s2397_s5 + $0x140] sm:$0xff]  ;;  %v1608_v56 = vcombine.low %v2208_v45, %v2213_v46  ;;  %v806_v61 = vld [vmem:[%s2397_s5 + $0x68] sm:$0xff] }
  0x88   :  { %1657 = vmatprep.subr.bf16.mxu0 %v1743_v11  ;;  %1679 = vmatprep.subr.bf16.mxu1 %v1744_v12  ;;  %v1596_v11 = vcombine.low %v842_v7, %v846_v9  ;;  %v1597_v12 = vcombine.high %v842_v7, %v846_v9  ;;  %v837_v14 = vld [vmem:[%s2397_s5 + $0x160] sm:$0xff]  ;;  %v794_v5 = vld [vmem:[%s2397_s5 + $0x8] sm:$0xff] }
  0x89   :  { %v798_v6 = vld [vmem:[%s2397_s5 + $0x28] sm:$0xff] }
  0x8a   :  { %1658 = vmatpush3.bf16.msra.mxu0 %v1745_v15  ;;  %1680 = vmatpush3.bf16.msra.mxu1 %v1746_v16  ;;  %v1586_v15 = vcombine.low %v833_v13, %v837_v14  ;;  %v1587_v16 = vcombine.high %v833_v13, %v837_v14  ;;  %v1609_v14 = vcombine.high %v2208_v45, %v2213_v46 }
  0x8b   :  { %1659 = vmatprep.subr.bf16.mxu0 %v1747_v17  ;;  %1681 = vmatprep.subr.bf16.mxu1 %v1748_v18  ;;  %v834_v17 = vld [vmem:[%s2397_s5 + $0x148] sm:$0xff] }
  0x8c   :  { %v838_v18 = vld [vmem:[%s2397_s5 + $0x168] sm:$0xff] }
  0x8e   :  { %1660 = vmatpush3.bf16.msra.mxu0 %v1749_v19  ;;  %1682 = vmatpush3.bf16.msra.mxu1 %v1750_v20  ;;  %v825_v19 = vld [vmem:[%s2397_s5 + $0x100] sm:$0xff]  ;;  %v1588_v20 = vcombine.low %v834_v17, %v838_v18 }
  0x8f   :  { %1661 = vmatprep.subr.bf16.mxu0 %v1751_v21  ;;  %1683 = vmatprep.subr.bf16.mxu1 %v1752_v22  ;;  %v1589_v21 = vcombine.high %v834_v17, %v838_v18  ;;  %v829_v22 = vld [vmem:[%s2397_s5 + $0x120] sm:$0xff] }
  0x90   :  { %v1578_v31 = vcombine.low %v825_v19, %v829_v22 }
  0x92   :  { %1662 = vmatpush3.bf16.msra.mxu0 %v1753_v23  ;;  %1684 = vmatpush3.bf16.msra.mxu1 %v1754_v24  ;;  %v826_v23 = vld [vmem:[%s2397_s5 + $0x108] sm:$0xff] }
  0x93   :  { %1663 = vmatprep.subr.bf16.mxu0 %v1755_v25  ;;  %1685 = vmatprep.subr.bf16.mxu1 %v1756_v26  ;;  %v830_v24 = vld [vmem:[%s2397_s5 + $0x128] sm:$0xff]  ;;  %v1579_v25 = vcombine.high %v825_v19, %v829_v22 }
  0x94   :  { %v1581_v26 = vcombine.high %v826_v23, %v830_v24  ;;  %v1580_v32 = vcombine.low %v826_v23, %v830_v24 }
  0x96   :  { %1664 = vmatpush3.bf16.msra.mxu0 %v1757_v27  ;;  %1686 = vmatpush3.bf16.msra.mxu1 %v1758_v28  ;;  %v817_v27 = vld [vmem:[%s2397_s5 + $0xc0] sm:$0xff] }
  0x97   :  { %1665 = vmatprep.subr.bf16.mxu0 %v1759_v29  ;;  %1687 = vmatprep.subr.bf16.mxu1 %v1760_v30  ;;  %v821_v28 = vld [vmem:[%s2397_s5 + $0xe0] sm:$0xff]  ;;  %v818_v29 = vld [vmem:[%s2397_s5 + $0xc8] sm:$0xff] }
  0x98   :  { %v822_v30 = vld [vmem:[%s2397_s5 + $0xe8] sm:$0xff]  ;;  %v1571_v33 = vcombine.high %v817_v27, %v821_v28 }
  0x99   :  { %v1573_v34 = vcombine.high %v818_v29, %v822_v30 }
  0x9a   :  { %1666 = vmatpush3.bf16.msra.mxu0 %v1761_v35  ;;  %1688 = vmatpush3.bf16.msra.mxu1 %v1762_v36  ;;  %v809_v35 = vld [vmem:[%s2397_s5 + $0x80] sm:$0xff] }
  0x9b   :  { %1667 = vmatprep.subr.bf16.mxu0 %v1763_v37  ;;  %1689 = vmatprep.subr.bf16.mxu1 %v1764_v38  ;;  %v813_v36 = vld [vmem:[%s2397_s5 + $0xa0] sm:$0xff]  ;;  %v810_v37 = vld [vmem:[%s2397_s5 + $0x88] sm:$0xff] }
  0x9c   :  { %v814_v38 = vld [vmem:[%s2397_s5 + $0xa8] sm:$0xff]  ;;  %v1562_v62 = vcombine.low %v809_v35, %v813_v36 }
  0x9d   :  { %v1565_v57 = vcombine.high %v810_v37, %v814_v38 }
  0x9e   :  { %1668 = vmatpush3.bf16.msra.mxu0 %v1765_v41  ;;  %1690 = vmatpush3.bf16.msra.mxu1 %v1766_v42  ;;  %v2196_v41 = vld [vmem:[%s2397_s5 + $0x1d0] sm:$0xff] }
  0x9f   :  { %1669 = vmatprep.subr.bf16.mxu0 %v1767_v43  ;;  %1691 = vmatprep.subr.bf16.mxu1 %v1768_v44  ;;  %v2201_v42 = vld [vmem:[%s2397_s5 + $0x1f0] sm:$0xff]  ;;  %v1570_v43 = vcombine.low %v817_v27, %v821_v28 }
  0xa0   :  { %v1606_v44 = vcombine.low %v2196_v41, %v2201_v42  ;;  %v1607_v13 = vcombine.high %v2196_v41, %v2201_v42  ;;  %v828_v41 = vld [vmem:[%s2397_s5 + $0x118] sm:$0xff] }
  0xa1   :  { %v832_v42 = vld [vmem:[%s2397_s5 + $0x138] sm:$0xff] }
  0xa2   :  { %1670 = vmatpush3.bf16.msra.mxu0 %v1769_v47  ;;  %1692 = vmatpush3.bf16.msra.mxu1 %v1770_v48  ;;  %v1572_v47 = vcombine.low %v818_v29, %v822_v30  ;;  %v1563_v48 = vcombine.high %v809_v35, %v813_v36 }
  0xa3   :  { %1177 = vmatprep.subr.bf16.mxu0 %v1603_v63  ;;  %1220 = vmatprep.subr.bf16.mxu1 %v1605_v4  ;;  %v1564_v63 = vcombine.low %v810_v37, %v814_v38  ;;  %v797_v4 = vld [vmem:[%s2397_s5 + $0x20] sm:$0xff] }
  0xa5   :  { %709 = vmatmul.mubr.bf16.vlgmr.msra.gmra.mxu0 %v78_v58  ;;  %750 = vmatmul.mubr.bf16.vlgmr.msra.gmra.mxu1 %v80_v59  ;;  %v801_v58 = vld [vmem:[%s2397_s5 + $0x40] sm:$0xff] }
  0xa6   :  { %1209 = vmatprep.mubr.bf16.mxu0 %v1785_v1  ;;  %1252 = vmatprep.mubr.bf16.mxu1 %v1785_v1  ;;  %v805_v59 = vld [vmem:[%s2397_s5 + $0x60] sm:$0xff] }
  0xa7   :  { %1178 = vmatpush1.bf16.msra.mxu0 %v1602_v2  ;;  %1221 = vmatpush1.bf16.msra.mxu1 %v1604_v3  ;;  %v1555_v0 = vcombine.high %v801_v58, %v805_v59  ;;  %v1557_v2 = vcombine.high %v802_v60, %v806_v61  ;;  %v793_v3 = vld [vmem:[%s2397_s5] sm:$0xff]  ;;  %v1554_v7 = vcombine.low %v801_v58, %v805_v59 }
  0xa8   :  { %1179 = vmatprep.subr.bf16.mxu0 %v1595_v8  ;;  %1222 = vmatprep.subr.bf16.mxu1 %v1597_v12  ;;  %v1556_v8 = vcombine.low %v802_v60, %v806_v61  ;;  %v1547_v9 = vcombine.high %v793_v3, %v797_v4  ;;  %v1548_v12 = vcombine.low %v794_v5, %v798_v6 }
  0xab   :  { %1180 = vmatpush1.bf16.msra.mxu0 %v1594_v10  ;;  %1223 = vmatpush1.bf16.msra.mxu1 %v1596_v11  ;;  %v1549_v10 = vcombine.high %v794_v5, %v798_v6  ;;  %v1546_v11 = vcombine.low %v793_v3, %v797_v4  ;;  %v1545_v6 = vld [vmem:[%s2396_s4 + $0x3] ss:$0 sm:$0xff] }
  0xac   :  { %1181 = vmatprep.subr.bf16.mxu0 %v1587_v16  ;;  %1224 = vmatprep.subr.bf16.mxu1 %v1589_v21 }
  0xaf   :  { %1182 = vmatpush1.bf16.msra.mxu0 %v1586_v15  ;;  %1225 = vmatpush1.bf16.msra.mxu1 %v1588_v20 }
  0xb0   :  { %1183 = vmatprep.subr.bf16.mxu0 %v1579_v25  ;;  %1226 = vmatprep.subr.bf16.mxu1 %v1581_v26 }
  0xb3   :  { %1184 = vmatpush1.bf16.msra.mxu0 %v1578_v31  ;;  %1227 = vmatpush1.bf16.msra.mxu1 %v1580_v32  ;;  %v1542_v31 = vld [vmem:[%s2396_s4 + $0x1] ss:$0 sm:$0xff]  ;;  %v1543_v32 = vld [vmem:[%s2396_s4 + $0x2] ss:$0 sm:$0xff] }
  0xb4   :  { %1185 = vmatprep.subr.bf16.mxu0 %v1571_v33  ;;  %1228 = vmatprep.subr.bf16.mxu1 %v1573_v34  ;;  %v2251_v33 = vpop.permute.xlu0 %769  ;;  %v766_v37 = vmul.f32 %v1542_v31, %v1987_v55 }
  0xb5   :  { %v776_v38 = vmul.f32 %v1543_v32, %v2251_v33  ;;  %v1584_v32 = vcombine.low %v828_v41, %v832_v42 }
  0xb7   :  { %1186 = vmatpush1.bf16.msra.mxu0 %v1570_v43  ;;  %1229 = vmatpush1.bf16.msra.mxu1 %v1572_v47  ;;  %v1544_v47 = vld [vmem:[%s2396_s4] ss:$0 sm:$0xff] }
  0xb8   :  { %1187 = vmatprep.subr.bf16.mxu0 %v1563_v48  ;;  %1230 = vmatprep.subr.bf16.mxu1 %v1565_v57 }
  0xbb   :  { %1188 = vmatpush1.bf16.msra.mxu0 %v1562_v62  ;;  %1231 = vmatpush1.bf16.msra.mxu1 %v1564_v63 }
  0xbc   :  { %1189 = vmatprep.subr.bf16.mxu0 %v1555_v0  ;;  %1232 = vmatprep.subr.bf16.mxu1 %v1557_v2 }
  0xbf   :  { %1190 = vmatpush1.bf16.msra.mxu0 %v1554_v7  ;;  %1233 = vmatpush1.bf16.msra.mxu1 %v1556_v8 }
  0xc0   :  { %1191 = vmatprep.subr.bf16.mxu0 %v1547_v9  ;;  %1234 = vmatprep.subr.bf16.mxu1 %v1549_v10  ;;  %v843_v10 = vld [vmem:[%s2397_s5 + $0x190] sm:$0xff] }
  0xc3   :  { %1192 = vmatpush1.bf16.msra.mxu0 %v1546_v11  ;;  %1235 = vmatpush1.bf16.msra.mxu1 %v1548_v12  ;;  %v847_v11 = vld [vmem:[%s2397_s5 + $0x1b0] sm:$0xff]  ;;  %v844_v12 = vld [vmem:[%s2397_s5 + $0x198] sm:$0xff] }
  0xc4   :  { %1263 = vmatprep.subr.bf16.mxu0 %v1607_v13  ;;  %1306 = vmatprep.subr.bf16.mxu1 %v1609_v14  ;;  %v848_v13 = vld [vmem:[%s2397_s5 + $0x1b8] sm:$0xff] }
 0x145   :  { %v1627_v15 = vpop.f32.mrf.mxu0  ;;  %v1649_v16 = vpop.f32.mrf.mxu1 }
 0x147   :  { %v1628_v17 = vpop.f32.mrf.mxu0  ;;  %v1650_v18 = vpop.f32.mrf.mxu1 }
 0x148   :  { %v1629_v23 = vadd.f32 %v1628_v17, %v1627_v15  ;;  %v1651_v24 = vadd.f32 %v1650_v18, %v1649_v16  ;;  %v1599_v16 = vcombine.high %v843_v10, %v847_v11  ;;  %v1601_v17 = vcombine.high %v844_v12, %v848_v13  ;;  %v835_v18 = vld [vmem:[%s2397_s5 + $0x150] sm:$0xff] }
 0x149   :  { %v1630_v19 = vpop.f32.mrf.mxu0  ;;  %v1652_v20 = vpop.f32.mrf.mxu1 }
 0x14a   :  { %v670_v29 = vadd.f32 %v1651_v24, %v1629_v23  ;;  %v1600_v23 = vcombine.low %v844_v12, %v848_v13 }
 0x14b   :  { %v1631_v21 = vpop.f32.mrf.mxu0  ;;  %v1653_v22 = vpop.f32.mrf.mxu1 }
 0x14c   :  { %v1632_v60 = vadd.f32 %v1631_v21, %v1630_v19  ;;  %v1654_v61 = vadd.f32 %v1653_v22, %v1652_v20  ;;  %v839_v19 = vld [vmem:[%s2397_s5 + $0x170] sm:$0xff]  ;;  %v836_v20 = vld [vmem:[%s2397_s5 + $0x158] sm:$0xff]  ;;  %v1598_v22 = vcombine.low %v843_v10, %v847_v11 }
 0x14d   :  { %v840_v21 = vld [vmem:[%s2397_s5 + $0x178] sm:$0xff]  ;;  %v1591_v24 = vcombine.high %v835_v18, %v839_v19 }
 0x14e   :  { %v673_v0 = vadd.f32 %v1654_v61, %v1632_v60  ;;  %v1592_v45 = vcombine.low %v836_v20, %v840_v21  ;;  %v807_v60 = vld [vmem:[%s2397_s5 + $0x70] sm:$0xff]  ;;  %v804_v61 = vld [vmem:[%s2397_s5 + $0x58] sm:$0xff] }
 0x165   :  { %v1671_v25 = vpop.f32.mrf.mxu0  ;;  %v1693_v26 = vpop.f32.mrf.mxu1 }
 0x167   :  { %v1672_v27 = vpop.f32.mrf.mxu0  ;;  %v1694_v28 = vpop.f32.mrf.mxu1 }
 0x168   :  { %v1673_v30 = vadd.f32 %v1672_v27, %v1671_v25  ;;  %v1695_v35 = vadd.f32 %v1694_v28, %v1693_v26  ;;  %v1593_v25 = vcombine.high %v836_v20, %v840_v21  ;;  %v827_v26 = vld [vmem:[%s2397_s5 + $0x110] sm:$0xff] }
 0x169   :  { %v1674_v57 = vpop.f32.mrf.mxu0  ;;  %v1696_v62 = vpop.f32.mrf.mxu1  ;;  %v831_v27 = vld [vmem:[%s2397_s5 + $0x130] sm:$0xff] }
 0x16a   :  { %v711_v34 = vadd.f32 %v1673_v30, %v670_v29  ;;  %v1583_v46 = vcombine.high %v827_v26, %v831_v27  ;;  %v819_v28 = vld [vmem:[%s2397_s5 + $0xd0] sm:$0xff]  ;;  %v824_v30 = vld [vmem:[%s2397_s5 + $0xf8] sm:$0xff]  ;;  %v1582_v31 = vcombine.low %v827_v26, %v831_v27 }
 0x16b   :  { %v1675_v59 = vpop.f32.mrf.mxu0  ;;  %v1697_v2 = vpop.f32.mrf.mxu1  ;;  %v823_v29 = vld [vmem:[%s2397_s5 + $0xf0] sm:$0xff] }
 0x16c   :  { %v752_v36 = vadd.f32 %v1695_v35, %v711_v34  ;;  %v1676_v63 = vadd.f32 %v1675_v59, %v1674_v57  ;;  %v1698_v55 = vadd.f32 %v1697_v2, %v1696_v62  ;;  %v1575_v34 = vcombine.high %v819_v28, %v823_v29  ;;  %v803_v59 = vld [vmem:[%s2397_s5 + $0x50] sm:$0xff]  ;;  %v808_v62 = vld [vmem:[%s2397_s5 + $0x78] sm:$0xff] }
 0x16d   :  { %v1559_v2 = vcombine.high %v803_v59, %v807_v60 }
 0x16e   :  { %v767_v43 = vadd.f32 %v766_v37, %v752_v36  ;;  %v714_v3 = vadd.f32 %v1676_v63, %v673_v0  ;;  %v811_v36 = vld [vmem:[%s2397_s5 + $0x90] sm:$0xff] }
 0x16f   :  { %v815_v37 = vld [vmem:[%s2397_s5 + $0xb0] sm:$0xff] }
 0x170   :  { %v777_v48 = vadd.f32 %v776_v38, %v767_v43  ;;  %v755_v4 = vadd.f32 %v1698_v55, %v714_v3  ;;  %v812_v38 = vld [vmem:[%s2397_s5 + $0x98] sm:$0xff]  ;;  %v1567_v57 = vcombine.high %v811_v36, %v815_v37  ;;  %v1566_v63 = vcombine.low %v811_v36, %v815_v37  ;;  %v795_v55 = vld [vmem:[%s2397_s5 + $0x10] sm:$0xff] }
 0x171   :  { %v816_v43 = vld [vmem:[%s2397_s5 + $0xb8] sm:$0xff]  ;;  %v1561_v3 = vcombine.high %v804_v61, %v808_v62 }
 0x172   :  { %v782_v58 = vadd.f32 %v1544_v47, %v777_v48  ;;  %v787_v8 = vadd.f32 %v1545_v6, %v755_v4  ;;  %v1574_v47 = vcombine.low %v819_v28, %v823_v29  ;;  %v1568_v0 = vcombine.low %v812_v38, %v816_v43  ;;  %v799_v4 = vld [vmem:[%s2397_s5 + $0x30] sm:$0xff]  ;;  %v800_v6 = vld [vmem:[%s2397_s5 + $0x38] sm:$0xff] }
 0x173   :  { %v1550_v11 = vcombine.low %v795_v55, %v799_v4 }
 0x174   :  { %1771 = vtanh.f32 %v782_v58  ;;  %v1569_v58 = vcombine.high %v812_v38, %v816_v43 }
 0x181   :  { %v1772_v5 = vpop.eup %1771 }
 0x182   :  { %v789_v7 = vmul.f32 %v1772_v5, %v1772_v5 }
 0x184   :  { %v790_v9 = vsub.f32 1.0, %v789_v7  ;;  %v1558_v7 = vcombine.low %v803_v59, %v807_v60 }
 0x186   :  { %v791_v14 = vmul.f32 %v790_v9, %v787_v8  ;;  %v1560_v8 = vcombine.low %v804_v61, %v808_v62  ;;  %v1551_v9 = vcombine.high %v795_v55, %v799_v4 }
 0x188   :  { %v2273_v15 = vpack.c.bf16 %v791_v14, %v1772_v5  ;;  %v796_v5 = vld [vmem:[%s2397_s5 + $0x18] sm:$0xff] }
 0x189   :  { %v1553_v10 = vcombine.high %v796_v5, %v800_v6  ;;  %v1552_v12 = vcombine.low %v796_v5, %v800_v6 }
 0x18a   :  { %1210 = vmatmul.mubr.bf16.vlgmr.msra.gmra.mxu0 %v2273_v15  ;;  %1253 = vmatmul.mubr.bf16.vlgmr.msra.gmra.mxu1 %v2273_v15 }
 0x18b   :  { %1264 = vmatpush1.bf16.msra.mxu0 %v1606_v44  ;;  %1307 = vmatpush1.bf16.msra.mxu1 %v1608_v56  ;;  %v1590_v44 = vcombine.low %v835_v18, %v839_v19  ;;  %v1585_v56 = vcombine.high %v828_v41, %v832_v42 }
 0x18c   :  { %1265 = vmatprep.subr.bf16.mxu0 %v1599_v16  ;;  %1308 = vmatprep.subr.bf16.mxu1 %v1601_v17  ;;  %v1351_v16 = vlaneseq }
 0x18d   :  { %1295 = vmatprep.mubr.bf16.mxu0 %v1785_v1  ;;  %1338 = vmatprep.mubr.bf16.mxu1 %v1785_v1  ;;  %v820_v1 = vld [vmem:[%s2397_s5 + $0xd8] sm:$0xff] }
 0x18e   :  { %v1577_v35 = vcombine.high %v820_v1, %v824_v30  ;;  %v1576_v48 = vcombine.low %v820_v1, %v824_v30  ;;  %v2359_v19 = vshrl.u32 %v1351_v16, 7 }
 0x18f   :  { %1266 = vmatpush1.bf16.msra.mxu0 %v1598_v22  ;;  %1309 = vmatpush1.bf16.msra.mxu1 %v1600_v23 }
 0x190   :  { %1267 = vmatprep.subr.bf16.mxu0 %v1591_v24  ;;  %1310 = vmatprep.subr.bf16.mxu1 %v1593_v25  ;;  %v1357_v21 = vsub.s32 1, %v2359_v19  ;;  %v1353_v23 = vsub.s32 0, %v2359_v19  ;;  %v1349_v25 = vld [vmem:[%s2398_s6] sm:$0xff]  ;;  %v1361_v42 = vsub.s32 2, %v2359_v19  ;;  %v1365_v30 = vsub.s32 3, %v2359_v19 }
 0x191   :  { %v1373_v59 = vsub.s32 5, %v2359_v19  ;;  %vm1447_vm0 = vcmp.lt.s32.totalorder %v2359_v19, 2 }
 0x192   :  { %v1354_v41 = vrot.slane %v1349_v25, %v1353_v23  ;;  %v1362_v1 = vrot.slane %v1349_v25, %v1361_v42  ;;  %v1366_v37 = vrot.slane %v1349_v25, %v1365_v30 }
 0x193   :  { %1268 = vmatpush1.bf16.msra.mxu0 %v1590_v44  ;;  %1311 = vmatpush1.bf16.msra.mxu1 %v1592_v45  ;;  %v1374_v6 = vrot.slane %v1349_v25, %v1373_v59 }
 0x194   :  { %1269 = vmatprep.subr.bf16.mxu0 %v1583_v46  ;;  %1312 = vmatprep.subr.bf16.mxu1 %v1585_v56 }
 0x197   :  { %1270 = vmatpush1.bf16.msra.mxu0 %v1582_v31  ;;  %1313 = vmatpush1.bf16.msra.mxu1 %v1584_v32 }
 0x198   :  { %1271 = vmatprep.subr.bf16.mxu0 %v1575_v34  ;;  %1314 = vmatprep.subr.bf16.mxu1 %v1577_v35 }
 0x19b   :  { %1272 = vmatpush1.bf16.msra.mxu0 %v1574_v47  ;;  %1315 = vmatpush1.bf16.msra.mxu1 %v1576_v48 }
 0x19c   :  { %1273 = vmatprep.subr.bf16.mxu0 %v1567_v57  ;;  %1316 = vmatprep.subr.bf16.mxu1 %v1569_v58  ;;  %v1377_v58 = vsub.s32 6, %v2359_v19 }
 0x19e   :  { %v1378_v55 = vrot.slane %v1349_v25, %v1377_v58 }
 0x19f   :  { %1274 = vmatpush1.bf16.msra.mxu0 %v1566_v63  ;;  %1317 = vmatpush1.bf16.msra.mxu1 %v1568_v0  ;;  %v1381_v0 = vsub.s32 7, %v2359_v19 }
 0x1a0   :  { %1275 = vmatprep.subr.bf16.mxu0 %v1559_v2  ;;  %1318 = vmatprep.subr.bf16.mxu1 %v1561_v3 }
 0x1a3   :  { %1276 = vmatpush1.bf16.msra.mxu0 %v1558_v7  ;;  %1319 = vmatpush1.bf16.msra.mxu1 %v1560_v8 }
 0x1a4   :  { %1277 = vmatprep.subr.bf16.mxu0 %v1551_v9  ;;  %1320 = vmatprep.subr.bf16.mxu1 %v1553_v10  ;;  %v1382_v10 = vrot.slane %v1349_v25, %v1381_v0 }
 0x1a7   :  { %1278 = vmatpush1.bf16.msra.mxu0 %v1550_v11  ;;  %1321 = vmatpush1.bf16.msra.mxu1 %v1552_v12 }
 0x1aa   :  { %1296 = vmatmul.mubr.bf16.vlgmr.msra.gmra.mxu0 %v2273_v15  ;;  %1339 = vmatmul.mubr.bf16.vlgmr.msra.gmra.mxu1 %v2273_v15  ;;  %v1358_v15 = vrot.slane %v1349_v25, %v1357_v21 }
 0x24a   :  { %v1211_v13 = vpop.f32.mrf.mxu0  ;;  %v1254_v18 = vpop.f32.mrf.mxu1 }
 0x24b   :  { %v1391_v29 = vadd.f32 %v1354_v41, %v1211_v13  ;;  %v1393_v36 = vadd.f32 %v1362_v1, %v1254_v18 }
 0x24c   :  { %v1213_v14 = vpop.f32.mrf.mxu0  ;;  %v1256_v22 = vpop.f32.mrf.mxu1 }
 0x24d   :  { %v1392_v45 = vadd.f32 %v1358_v15, %v1213_v14  ;;  %v1394_v60 = vadd.f32 %v1366_v37, %v1256_v22 }
 0x24e   :  { %v1215_v17 = vpop.f32.mrf.mxu0  ;;  %v1258_v27 = vpop.f32.mrf.mxu1 }
 0x24f   :  { %v1399_v26 = vmul.f32 %v1215_v17, %v2251_v33  ;;  %v1401_v56 = vmul.f32 %v1258_v27, %v2251_v33 }
 0x250   :  { %v1217_v20 = vpop.f32.mrf.mxu0  ;;  %v1260_v28 = vpop.f32.mrf.mxu1 }
 0x251   :  { %v1400_v24 = vmul.f32 %v1217_v20, %v2251_v33  ;;  %v1407_v46 = vsub.f32 %v1979_v51, %v1399_v26  ;;  %v1409_v34 = vsub.f32 %v1981_v52, %v1401_v56  ;;  %v1402_v35 = vmul.f32 %v1260_v28, %v2251_v33 }
 0x253   :  { %v1408_v44 = vsub.f32 %v1975_v49, %v1400_v24  ;;  %v1415_v32 = vsub.f32 %v1391_v29, %v1407_v46  ;;  %v1369_v49 = vsub.s32 4, %v2359_v19  ;;  %v1417_v51 = vsub.f32 %v1393_v36, %v1409_v34 }
 0x254   :  { %v1410_v47 = vsub.f32 %v1977_v50, %v1402_v35 }
 0x255   :  { %v1416_v31 = vsub.f32 %v1392_v45, %v1408_v44  ;;  %v1423_v43 = vmul.f32 %v1415_v32, %v1415_v32  ;;  %v1370_v52 = vrot.slane %v1349_v25, %v1369_v49  ;;  %v1425_v2 = vmul.f32 %v1417_v51, %v1417_v51 }
 0x256   :  { %v1418_v3 = vsub.f32 %v1394_v60, %v1410_v47 }
 0x257   :  { %v1424_v38 = vmul.f32 %v1416_v31, %v1416_v31 }
 0x258   :  { %v1426_v18 = vmul.f32 %v1418_v3, %v1418_v3 }
 0x259   :  { %v1431_v61 = vadd.f32 %v1424_v38, %v1423_v43 }
 0x25b   :  { %v1432_v8 = vadd.f32 %v1431_v61, %v1425_v2 }
 0x25d   :  { %v1433_v15 = vadd.f32 %v1432_v8, %v1426_v18 }
 0x26a   :  { %v1297_v48 = vpop.f32.mrf.mxu0  ;;  %v1340_v57 = vpop.f32.mrf.mxu1 }
 0x26b   :  { %v1395_v9 = vadd.f32 %v1370_v52, %v1297_v48  ;;  %v1397_v20 = vadd.f32 %v1378_v55, %v1340_v57 }
 0x26c   :  { %v1299_v62 = vpop.f32.mrf.mxu0  ;;  %v1342_v63 = vpop.f32.mrf.mxu1 }
 0x26d   :  { %v1396_v21 = vadd.f32 %v1374_v6, %v1299_v62  ;;  %v1398_v25 = vadd.f32 %v1382_v10, %v1342_v63 }
 0x26e   :  { %v1301_v4 = vpop.f32.mrf.mxu0  ;;  %v1344_v5 = vpop.f32.mrf.mxu1 }
 0x26f   :  { %v1403_v50 = vmul.f32 %v1301_v4, %v2251_v33  ;;  %v1405_v7 = vmul.f32 %v1344_v5, %v2251_v33 }
 0x270   :  { %v1303_v11 = vpop.f32.mrf.mxu0  ;;  %v1346_v12 = vpop.f32.mrf.mxu1 }
 0x271   :  { %v1411_v13 = vsub.f32 %v2091_v39, %v1403_v50  ;;  %v1413_v14 = vsub.f32 %v2093_v40, %v1405_v7  ;;  %v1404_v16 = vmul.f32 %v1303_v11, %v2251_v33  ;;  %v1406_v17 = vmul.f32 %v1346_v12, %v2251_v33 }
 0x273   :  { %v1419_v22 = vsub.f32 %v1395_v9, %v1411_v13  ;;  %v1412_v23 = vsub.f32 %v1983_v53, %v1404_v16  ;;  %v1414_v24 = vsub.f32 %v1985_v54, %v1406_v17  ;;  %v1421_v41 = vsub.f32 %v1397_v20, %v1413_v14 }
 0x274   :  { %v1787_v54 = vmov 0.0  }
 0x275   :  { %v1427_v26 = vmul.f32 %v1419_v22, %v1419_v22  ;;  %v1420_v27 = vsub.f32 %v1396_v21, %v1412_v23  ;;  %v1422_v42 = vsub.f32 %v1398_v25, %v1414_v24  ;;  %v1429_v44 = vmul.f32 %v1421_v41, %v1421_v41 }
 0x276   :  { %v1610_v30 = vsel %vm1447_vm0, 1.0, %v1787_v54 }
 0x277   :  { %v1428_v39 = vmul.f32 %v1420_v27, %v1420_v27  ;;  %v1434_v40 = vadd.f32 %v1433_v15, %v1427_v26  ;;  %v1430_v46 = vmul.f32 %v1422_v42, %v1422_v42 }
 0x279   :  { %v1435_v45 = vadd.f32 %v1434_v40, %v1428_v39 }
 0x27b   :  { %v1436_v33 = vadd.f32 %v1435_v45, %v1429_v44 }
 0x27d   :  { %v1437_v56 = vadd.f32 %v1436_v33, %v1430_v46 }
 0x27f   :  { %1438 = vadd.xlane.f32.xlu1 %v1437_v56 }
 0x308   :  { %v1439_v28 = vpop.xlane.xlu1 %1438 }
 0x309   :  { %v1441_v29 = vmul.f32 0.0009765625, %v1439_v28 }
 0x30b   :  { %v1442_v1 = vadd.f32 0.001, %v1441_v29 }
 0x30d   :  { %1773 = vrsqrt.f32 %v1442_v1 }
 0x31a   :  { %v1774_v53 = vpop.eup %1773 }
 0x31b   :  { %v1444_v31 = vmul.f32 %v1774_v53, %v1441_v29 }
 0x31d   :  { %v1450_v32 = vmul.f32 %v1610_v30, %v1444_v31 }
 0x31f   :  { %v1452_v34 = vsel %vm1451_vm1, %v1450_v32, 0.0 }
 0x320   :  { %1453 = vadd.xlane.f32.xlu1 %v1452_v34 }
 0x3a9   :  { %v1454_v35 = vpop.xlane.xlu1 %1453 }
 0x3aa   :  { %v1455_v36 = vrot.slane %v1454_v35, 4 }
 0x3ac   :  { %v1456_v37 = vadd.f32 %v1455_v36, %v1454_v35 }
 0x3ae   :  { %v1457_v38 = vrot.slane %v1456_v37, 2 }
 0x3b0   :  { %v1458_v49 = vadd.f32 %v1457_v38, %v1456_v37 }
 0x3b2   :  { %v1459_v43 = vrot.slane %v1458_v49, 1 }
 0x3b4   :  { %v1460_v51 = vadd.f32 %v1459_v43, %v1458_v49 }
 0x3b6   :  { %1699 = vpush %v1460_v51 }
 0x3e7   :  { %s1700_s6 = spop %1699 }
 0x3e8   :  { %s1462_s16 = smul.f32 0.5, %s1700_s6 }
 0x3ea   :  { %1464 = sst [smem:[#allocation2]] %s1462_s16 }
 0x3eb   :  { %1472 = dma.smem_to_hbm %s1788_s17, 16, %s2399_s7, [#allocation3]  }
 0x3ec   :  { %1783 = dma.done.wait [#allocation3], 16  }
 0x3ed   :  { %1784 = vsyncadd [#allocation3], 4294967280 }
 0x3ee   :  { %1476 = sfence }
 0x3ef   :  { %1477 = vsyncpa [#allocation3], 1 }

</bundles_post_ra>
